<compile_context>
chip_gen: v5e
topology: v5e:2x2
jax: 0.10.0
libtpu: 0.0.40
codegen_flags: <defaults>
</compile_context>

<pallas_src>
import functools
import math

import jax
import jax.numpy as jnp
from jax.experimental import pallas as pl
from jax.experimental.pallas import tpu as pltpu


_SQRT1_2 = 0.7071067811865476


# --------------------------- hardware-aware config ----------------------------

def _vmem_capacity_bytes():
    try:
        info = pltpu.get_tpu_info()
        cap = getattr(info, "vmem_capacity_bytes", None)
        if cap:
            return int(cap)
    except Exception:
        pass
    return 64 * 1024 * 1024          # conservative (v7x-sized) fallback


_VMEM_CAP = _vmem_capacity_bytes()
_VMEM_LIMIT = int(_VMEM_CAP * 0.85)  # ~54 MiB on v7x, ~108 MiB on v5e/v6e
_SEQ_TILE_TARGET = 256 if _VMEM_CAP >= (96 << 20) else 128


_BUFFERED_OK = None


def _probe_single_buffered():
    """Check (once) that pipeline_mode=pl.Buffered(1) compiles & runs on this JAX."""
    global _BUFFERED_OK
    if _BUFFERED_OK is not None:
        return _BUFFERED_OK

    def _copy(x_ref, o_ref):
        o_ref[...] = x_ref[...] + 1.0

    try:
        spec = pl.BlockSpec((8, 128), lambda i: (0, 0), pipeline_mode=pl.Buffered(1))
        out = pl.pallas_call(
            _copy,
            out_shape=jax.ShapeDtypeStruct((8, 128), jnp.float32),
            grid=(1,),
            in_specs=[spec],
            out_specs=pl.BlockSpec((8, 128), lambda i: (0, 0)),
        )(jnp.zeros((8, 128), jnp.float32))
        jax.block_until_ready(out)
        _BUFFERED_OK = True
    except Exception:
        _BUFFERED_OK = False
    return _BUFFERED_OK


def _const_spec(shape):
    """Spec for a grid-invariant operand (weights/biases): single-buffered if possible."""
    nd = len(shape)
    index_map = lambda *_: (0,) * nd
    if _probe_single_buffered():
        return pl.BlockSpec(shape, index_map, pipeline_mode=pl.Buffered(1))
    return pl.BlockSpec(shape, index_map)


def _plan_seq(t, target=_SEQ_TILE_TARGET):
    """Pick (tile, padded_len): tile multiple of 8, padded_len multiple of tile."""
    if t <= target:
        tile = max(8, -(-t // 8) * 8)
        return tile, tile
    return target, -(-t // target) * target


# ----------------------------- in-kernel helpers ------------------------------

def _gelu(x):
    # exact (erf-based) GELU, matching torch.nn.functional.gelu default
    return 0.5 * x * (1.0 + jax.lax.erf(x * _SQRT1_2))


def _layernorm(x, w, b, eps=1e-5):
    mu = jnp.mean(x, axis=-1, keepdims=True)
    xc = x - mu
    var = jnp.mean(xc * xc, axis=-1, keepdims=True)
    return xc * jax.lax.rsqrt(var + eps) * w + b


def _bf16(x):
    return x.astype(jnp.bfloat16)


# --------------------------------- kernels ------------------------------------

def conv_stem_kernel(xpe_ref, xpo_ref, w1_ref, b1_ref, w2_ref, b2_ref, pos_ref, o_ref):
    """conv1(k=3,s=1,p=1)+GELU -> conv2(k=3,s=2,p=1)+GELU -> +pos for one time tile.

    xpe/xpo are the even/odd time phases of the zero-padded input, extended with one
    leading zero row and zero-padded to the padded sequence length; they stay VMEM
    resident across time tiles and the +/-1 halo is read with in-kernel dynamic slices.
    """
    tc = o_ref.shape[1]
    start = pl.multiple_of(pl.program_id(1) * tc, 8)

    def dot(a, w):
        return jnp.dot(a, w, preferred_element_type=jnp.float32)

    xe = xpe_ref[0, pl.ds(start + 1, tc + 1), :]      # xpe[start : start+tc+1]
    xo = xpo_ref[0, pl.ds(start + 1, tc + 1), :]      # xpo[start : start+tc+1]
    xo_m = xpo_ref[0, pl.ds(start, tc + 1), :]        # xpo[start-1 : start+tc]

    e0 = _bf16(xe[:tc])
    o0 = _bf16(xo[:tc])
    e1 = _bf16(xe[1:])

    # conv1 even rows h1[2s], s in [start, start+tc)
    h_even = _gelu(dot(e0, w1_ref[0]) + dot(o0, w1_ref[1]) + dot(e1, w1_ref[2])
                   + b1_ref[...])
    # conv1 odd rows h1[2s+1], s in [start-1, start+tc)  (tc+1 rows, halo row included)
    h_odd = _gelu(dot(_bf16(xo_m), w1_ref[0]) + dot(_bf16(xe), w1_ref[1])
                  + dot(_bf16(xo), w1_ref[2]) + b1_ref[...])
    # row for s == -1 is conv2's zero pad, not a conv of zero-padded input
    row = jax.lax.broadcasted_iota(jnp.int32, (tc + 1, 1), 0)
    h_odd = jnp.where(start - 1 + row >= 0, h_odd, 0.0)

    # conv2 (stride 2): y[t'] = w2[0] h_odd[t'-1] + w2[1] h_even[t'] + w2[2] h_odd[t']
    y = (dot(_bf16(h_odd[:tc]), w2_ref[0]) + dot(_bf16(h_even), w2_ref[1])
         + dot(_bf16(h_odd[1:]), w2_ref[2]) + b2_ref[...])
    o_ref[0] = (_gelu(y) + pos_ref[...]).astype(o_ref.dtype)


def ln_qkv_kernel(x_ref, lnw_ref, lnb_ref, wqkv_ref, bqkv_ref, q_ref, k_ref, v_ref):
    """Pre-LN + fused QKV projection for one (tile_T, D) activation tile."""
    d = x_ref.shape[2]
    h = _layernorm(x_ref[0].astype(jnp.float32), lnw_ref[...], lnb_ref[...])
    qkv = jnp.dot(_bf16(h), wqkv_ref[...],
                  preferred_element_type=jnp.float32) + bqkv_ref[...]
    q_ref[0] = qkv[:, :d].astype(q_ref.dtype)          # dh**-0.25 scale folded in
    k_ref[0] = qkv[:, d:2 * d].astype(k_ref.dtype)     # key has no bias (zeros folded)
    v_ref[0] = qkv[:, 2 * d:].astype(v_ref.dtype)


def attn_mlp_kernel(x_ref, q_ref, kT_ref, v_ref,
                    wo_ref, bo_ref, mlnw_ref, mlnb_ref,
                    w1_ref, b1_ref, w2_ref, b2_ref,
                    plnw_ref, plnb_ref,
                    o_ref, m_sc, l_sc, acc_sc,
                    *, apply_ln_post, seq_len, padded_len):
    """Flash attention over KV tiles + out-proj + residual + pre-LN MLP + residual."""
    kt = pl.program_id(2)
    tkv = kT_ref.shape[3]

    @pl.when(kt == 0)
    def _init():
        m_sc[...] = jnp.full(m_sc.shape, -jnp.inf, jnp.float32)
        l_sc[...] = jnp.zeros(l_sc.shape, jnp.float32)
        acc_sc[...] = jnp.zeros(acc_sc.shape, jnp.float32)

    q = q_ref[0]                          # (H, tq, dh)  bf16 (pre-scaled)
    k = kT_ref[0]                         # (H, dh, tkv) bf16 (pre-scaled, pre-transposed)
    v = v_ref[0]                          # (H, tkv, dh) bf16

    s = jnp.einsum("hqd,hdk->hqk", q, k, preferred_element_type=jnp.float32)
    if seq_len < padded_len:              # mask padded key positions (static branch)
        kv_idx = kt * tkv + jax.lax.broadcasted_iota(jnp.int32, (1, 1, tkv), 2)
        s = jnp.where(kv_idx < seq_len, s, -1e30)

    m_prev = m_sc[...]
    m_new = jnp.maximum(m_prev, jnp.max(s, axis=-1, keepdims=True))
    alpha = jnp.exp(m_prev - m_new)
    p = jnp.exp(s - m_new)
    l_sc[...] = alpha * l_sc[...] + jnp.sum(p, axis=-1, keepdims=True)
    acc_sc[...] = alpha * acc_sc[...] + jnp.einsum(
        "hqk,hkd->hqd", _bf16(p), v, preferred_element_type=jnp.float32)
    m_sc[...] = m_new

    @pl.when(kt == pl.num_programs(2) - 1)
    def _finalize():
        n_head = acc_sc.shape[0]
        o = acc_sc[...] * pl.reciprocal(l_sc[...], approx=True)   # (H, tq, dh) f32
        # head merge along lanes (XLU/copy work only) -> ONE K=D out-projection matmul
        o_cat = jnp.concatenate([o[h] for h in range(n_head)], axis=-1)  # (tq, D)
        attn = jnp.dot(_bf16(o_cat), wo_ref[...],
                       preferred_element_type=jnp.float32) + bo_ref[...]
        x1 = x_ref[0].astype(jnp.float32) + attn                   # residual 1

        hm = _layernorm(x1, mlnw_ref[...], mlnb_ref[...])
        mid = _gelu(jnp.dot(_bf16(hm), w1_ref[...],
                            preferred_element_type=jnp.float32) + b1_ref[...])
        y = x1 + jnp.dot(_bf16(mid), w2_ref[...],
                         preferred_element_type=jnp.float32) + b2_ref[...]
        if apply_ln_post:                                           # fused final LayerNorm
            y = _layernorm(y, plnw_ref[...], plnb_ref[...])
        o_ref[0] = y.astype(o_ref.dtype)


def layernorm_kernel(x_ref, w_ref, b_ref, o_ref):
    o_ref[0] = _layernorm(x_ref[0].astype(jnp.float32),
                          w_ref[...], b_ref[...]).astype(o_ref.dtype)


# ------------------------------ pallas wrappers --------------------------------

def conv_stem(x_ncw, p, pos_pad, tile_t):
    """x: (B, n_mels, T_in) -> (B, T_pad, n_state) with pos embedding added."""
    B, c_in, t_in = x_ncw.shape
    assert t_in % 2 == 0, "conv stem assumes an even number of input frames"
    t_out = t_in // 2
    t_pad, d = pos_pad.shape
    assert t_pad % tile_t == 0 and t_pad >= t_out

    x_btc = jnp.transpose(x_ncw, (0, 2, 1))                  # (B, T, Cin)
    x_zp = jnp.pad(x_btc, ((0, 0), (1, 1), (0, 0)))          # (B, T+2, Cin)
    # even/odd phases of the padded input, each with 1 leading zero row and trailing
    # zeros up to t_pad+2 rows (so padded output tiles read zeros, never OOB)
    xpe = jnp.pad(x_zp[:, 0::2, :], ((0, 0), (1, t_pad - t_out), (0, 0)))
    xpo = jnp.pad(x_zp[:, 1::2, :], ((0, 0), (1, t_pad - t_out), (0, 0)))

    return pl.pallas_call(
        conv_stem_kernel,
        out_shape=jax.ShapeDtypeStruct((B, t_pad, d), jnp.float32),
        grid=(B, t_pad // tile_t),
        in_specs=[
            pl.BlockSpec((1, t_pad + 2, c_in), lambda b, t: (b, 0, 0)),
            pl.BlockSpec((1, t_pad + 2, c_in), lambda b, t: (b, 0, 0)),
            _const_spec(p["conv1_w"].shape),
            _const_spec(p["conv1_b"].shape),
            _const_spec(p["conv2_w"].shape),
            _const_spec(p["conv2_b"].shape),
            pl.BlockSpec((tile_t, d), lambda b, t: (t, 0)),
        ],
        out_specs=pl.BlockSpec((1, tile_t, d), lambda b, t: (b, t, 0)),
        compiler_params=pltpu.CompilerParams(
            dimension_semantics=("parallel", "parallel"),
            vmem_limit_bytes=_VMEM_LIMIT),
    )(xpe, xpo, p["conv1_w"], p["conv1_b"], p["conv2_w"], p["conv2_b"], pos_pad)


def ln_qkv(x, bp, tt):
    B, T, D = x.shape
    assert T % tt == 0
    io_spec = pl.BlockSpec((1, tt, D), lambda b, t: (b, t, 0))
    out_sd = jax.ShapeDtypeStruct((B, T, D), jnp.bfloat16)
    return pl.pallas_call(
        ln_qkv_kernel,
        out_shape=(out_sd, out_sd, out_sd),
        grid=(B, T // tt),
        in_specs=[io_spec,
                  _const_spec(bp["attn_ln_w"].shape),
                  _const_spec(bp["attn_ln_b"].shape),
                  _const_spec(bp["wqkv"].shape),
                  _const_spec(bp["bqkv"].shape)],
        out_specs=(io_spec, io_spec, io_spec),
        compiler_params=pltpu.CompilerParams(
            dimension_semantics=("parallel", "parallel"),
            vmem_limit_bytes=_VMEM_LIMIT),
    )(x, bp["attn_ln_w"], bp["attn_ln_b"], bp["wqkv"], bp["bqkv"])


def attn_mlp(x, qh, kTh, vh, bp, pln_w, pln_b, *, apply_ln_post, tq, tkv, seq_len):
    B, T, D = x.shape
    H, dh = qh.shape[1], qh.shape[3]
    assert T % tq == 0 and T % tkv == 0
    kernel = functools.partial(attn_mlp_kernel, apply_ln_post=apply_ln_post,
                               seq_len=seq_len, padded_len=T)
    x_spec = pl.BlockSpec((1, tq, D), lambda b, i, j: (b, i, 0))
    q_spec = pl.BlockSpec((1, H, tq, dh), lambda b, i, j: (b, 0, i, 0))
    kT_spec = pl.BlockSpec((1, H, dh, tkv), lambda b, i, j: (b, 0, 0, j))
    v_spec = pl.BlockSpec((1, H, tkv, dh), lambda b, i, j: (b, 0, j, 0))
    return pl.pallas_call(
        kernel,
        out_shape=jax.ShapeDtypeStruct((B, T, D), jnp.float32),
        grid=(B, T // tq, T // tkv),
        in_specs=[x_spec, q_spec, kT_spec, v_spec,
                  _const_spec(bp["wo"].shape), _const_spec(bp["bo"].shape),
                  _const_spec(bp["mlp_ln_w"].shape), _const_spec(bp["mlp_ln_b"].shape),
                  _const_spec(bp["w1"].shape), _const_spec(bp["b1"].shape),
                  _const_spec(bp["w2"].shape), _const_spec(bp["b2"].shape),
                  _const_spec(pln_w.shape), _const_spec(pln_b.shape)],
        out_specs=x_spec,
        scratch_shapes=[pltpu.VMEM((H, tq, 1), jnp.float32),
                        pltpu.VMEM((H, tq, 1), jnp.float32),
                        pltpu.VMEM((H, tq, dh), jnp.float32)],
        compiler_params=pltpu.CompilerParams(
            dimension_semantics=("parallel", "parallel", "arbitrary"),
            vmem_limit_bytes=_VMEM_LIMIT),
    )(x, qh, kTh, vh, bp["wo"], bp["bo"], bp["mlp_ln_w"], bp["mlp_ln_b"],
      bp["w1"], bp["b1"], bp["w2"], bp["b2"], pln_w, pln_b)


def run_layernorm(x, w, b, tt):
    # only used when n_layer == 0 (ln_post is otherwise fused into the last block)
    B, T, D = x.shape
    spec = pl.BlockSpec((1, tt, D), lambda b_, t: (b_, t, 0))
    return pl.pallas_call(
        layernorm_kernel,
        out_shape=jax.ShapeDtypeStruct((B, T, D), jnp.float32),
        grid=(B, T // tt),
        in_specs=[spec, _const_spec(w.shape), _const_spec(b.shape)],
        out_specs=spec,
        compiler_params=pltpu.CompilerParams(
            dimension_semantics=("parallel", "parallel"),
            vmem_limit_bytes=_VMEM_LIMIT),
    )(x, w, b)


# ------------------------------- model glue ------------------------------------

def sinusoids(length, channels, max_timescale=10000):
    assert channels % 2 == 0
    log_timescale_increment = math.log(max_timescale) / (channels // 2 - 1)
    inv_timescales = jnp.exp(
        -log_timescale_increment * jnp.arange(channels // 2, dtype=jnp.float32))
    scaled_time = jnp.arange(length, dtype=jnp.float32)[:, None] * inv_timescales[None, :]
    return jnp.concatenate([jnp.sin(scaled_time), jnp.cos(scaled_time)], axis=1)


def init_params(key, n_mels, n_state, n_head, n_layer):
    dh = n_state // n_head
    scale = dh ** -0.25
    n_mlp = 4 * n_state

    def normal(k, shape, s=0.05):
        return (s * jax.random.normal(k, shape)).astype(jnp.float32)

    keys = jax.random.split(key, 2 + max(n_layer, 1))
    p = {}
    # Conv1d weights in PyTorch layout (Cout, Cin, K) -> per-tap matmul layout (K, Cin, Cout)
    w_c1 = normal(keys[0], (n_state, n_mels, 3))
    w_c2 = normal(keys[1], (n_state, n_state, 3))
    p["conv1_w"] = _bf16(jnp.transpose(w_c1, (2, 1, 0)))
    p["conv1_b"] = jnp.full((1, n_state), 0.01, jnp.float32)
    p["conv2_w"] = _bf16(jnp.transpose(w_c2, (2, 1, 0)))
    p["conv2_b"] = jnp.full((1, n_state), 0.01, jnp.float32)

    blocks = []
    for li in range(n_layer):
        ks = jax.random.split(keys[2 + li], 6)
        wq = normal(ks[0], (n_state, n_state))
        wk = normal(ks[1], (n_state, n_state))   # key: no bias
        wv = normal(ks[2], (n_state, n_state))
        wo = normal(ks[3], (n_state, n_state))
        bq = jnp.full((1, n_state), 0.01, jnp.float32)
        bv = jnp.full((1, n_state), -0.01, jnp.float32)
        blocks.append({
            "attn_ln_w": jnp.ones((1, n_state), jnp.float32),
            "attn_ln_b": jnp.zeros((1, n_state), jnp.float32),
            # fused QKV with the dh**-0.25 scale folded into the Q/K weights & bias
            "wqkv": _bf16(jnp.concatenate([wq * scale, wk * scale, wv], axis=1)),
            "bqkv": jnp.concatenate(
                [bq * scale, jnp.zeros((1, n_state), jnp.float32), bv], axis=1),
            # out-projection as a single (D, D) matmul matrix (rows = h*dh + d)
            "wo": _bf16(wo),
            "bo": jnp.full((1, n_state), 0.005, jnp.float32),
            "mlp_ln_w": jnp.ones((1, n_state), jnp.float32),
            "mlp_ln_b": jnp.zeros((1, n_state), jnp.float32),
            "w1": _bf16(normal(ks[4], (n_state, n_mlp))),
            "b1": jnp.full((1, n_mlp), 0.01, jnp.float32),
            "w2": _bf16(normal(ks[5], (n_mlp, n_state))),
            "b2": jnp.full((1, n_state), 0.01, jnp.float32),
        })
    p["blocks"] = blocks
    p["ln_post_w"] = jnp.ones((1, n_state), jnp.float32)
    p["ln_post_b"] = jnp.zeros((1, n_state), jnp.float32)
    return p


def audio_encoder_forward(x, params, *, n_head, pos_emb):
    """x: (B, n_mels, T_in) float32 -> (B, n_ctx, n_state) float32."""
    B, _, t_in = x.shape
    t_out = t_in // 2
    n_state = pos_emb.shape[1]
    assert pos_emb.shape == (t_out, n_state), "incorrect audio shape"

    tile, t_pad = _plan_seq(t_out)
    pos_pad = jnp.pad(pos_emb, ((0, t_pad - t_out), (0, 0)))

    h = conv_stem(x, params, pos_pad, tile)                  # (B, T_pad, D) f32
    D = n_state
    dh = D // n_head
    n_layer = len(params["blocks"])

    for li, bp in enumerate(params["blocks"]):
        q, k, v = ln_qkv(h, bp, tile)                        # each (B, T_pad, D) bf16
        # TODO(synk): fold these head split / K^T relayouts into ln_qkv to drop the
        #             per-layer HBM round trip.
        qh = jnp.transpose(q.reshape(B, t_pad, n_head, dh), (0, 2, 1, 3))   # (B,H,T,dh)
        kT = jnp.transpose(k.reshape(B, t_pad, n_head, dh), (0, 2, 3, 1))   # (B,H,dh,T)
        vh = jnp.transpose(v.reshape(B, t_pad, n_head, dh), (0, 2, 1, 3))   # (B,H,T,dh)
        h = attn_mlp(h, qh, kT, vh, bp,
                     params["ln_post_w"], params["ln_post_b"],
                     apply_ln_post=(li == n_layer - 1),
                     tq=tile, tkv=tile, seq_len=t_out)
    if n_layer == 0:
        h = run_layernorm(h, params["ln_post_w"], params["ln_post_b"], tile)
    return h[:, :t_out, :]


# --------------------------- pure-JAX reference (f32) ---------------------------

def reference_forward(x, params, *, n_head, pos_emb):
    f32 = jnp.float32
    B, c_in, t_in = x.shape
    t_out = t_in // 2
    w1 = params["conv1_w"].astype(f32)
    w2 = params["conv2_w"].astype(f32)
    xt = jnp.transpose(x, (0, 2, 1))
    xp = jnp.pad(xt, ((0, 0), (1, 1), (0, 0)))
    h1 = sum(jnp.einsum("btc,cd->btd", xp[:, k:k + t_in, :], w1[k]) for k in range(3))
    h1 = _gelu(h1 + params["conv1_b"])
    hp = jnp.pad(h1, ((0, 0), (1, 1), (0, 0)))
    h2 = sum(jnp.einsum("btc,cd->btd", hp[:, k:k + 2 * t_out:2, :], w2[k])
             for k in range(3))
    h = _gelu(h2 + params["conv2_b"]) + pos_emb

    D = h.shape[-1]
    dh = D // n_head
    for bp in params["blocks"]:
        ln = _layernorm(h, bp["attn_ln_w"], bp["attn_ln_b"])
        qkv = ln @ bp["wqkv"].astype(f32) + bp["bqkv"]
        q, k, v = qkv[..., :D], qkv[..., D:2 * D], qkv[..., 2 * D:]

        def heads(t):
            return jnp.transpose(t.reshape(B, -1, n_head, dh), (0, 2, 1, 3))

        qh, kh, vh = heads(q), heads(k), heads(v)
        s = jnp.einsum("bhqd,bhkd->bhqk", qh, kh)
        a = jax.nn.softmax(s, axis=-1)
        o = jnp.einsum("bhqk,bhkd->bhqd", a, vh)
        o = jnp.transpose(o, (0, 2, 1, 3)).reshape(B, -1, D)
        h = h + o @ bp["wo"].astype(f32) + bp["bo"]

        ln2 = _layernorm(h, bp["mlp_ln_w"], bp["mlp_ln_b"])
        mid = _gelu(ln2 @ bp["w1"].astype(f32) + bp["b1"])
        h = h + mid @ bp["w2"].astype(f32) + bp["b2"]
    return _layernorm(h, params["ln_post_w"], params["ln_post_b"])


# ------------------------------------ main --------------------------------------

if __name__ == "__main__":
    # Small, self-consistent configuration: T_in = 16 -> n_ctx = 8 after stride-2 conv2
    batch, n_mels, t_in = 2, 4, 16
    n_state, n_head, n_layer = 32, 4, 2
    n_ctx = t_in // 2

    key = jax.random.PRNGKey(0)
    k_x, k_p = jax.random.split(key)
    x = jax.random.normal(k_x, (batch, n_mels, t_in), dtype=jnp.float32)
    params = init_params(k_p, n_mels, n_state, n_head, n_layer)
    pos_emb = sinusoids(n_ctx, n_state)

    out = audio_encoder_forward(x, params, n_head=n_head, pos_emb=pos_emb)
    out = jax.block_until_ready(out)

    assert out.shape == (batch, n_ctx, n_state)
    assert bool(jnp.isfinite(out).all())

    # loose tolerance: kernels use bf16 MXU operands (f32 accumulation) + approx recip
    ref = reference_forward(x, params, n_head=n_head, pos_emb=pos_emb)
    max_err = float(jnp.max(jnp.abs(out - ref)))
    assert max_err < 0.15, f"kernel/reference mismatch: max abs err {max_err}"

    print("KERNEL_OK")
</pallas_src>

<mosaic_0001>
module attributes {stable_mosaic.version = 11 : i64} {
  func.func @_copy(%arg0: i32, %arg1: memref<8x128xf32, #tpu.memory_space<vmem>>, %arg2: memref<8x128xf32, #tpu.memory_space<vmem>>) attributes {dimension_semantics = [#tpu.dimension_semantics<arbitrary>], iteration_bounds = array<i64: 1>, scalar_prefetch = 0 : i64, scratch_operands = 0 : i64, tpu.core_type = #tpu.core_type<tc>, window_params = [{pipeline_mode = #tpu.pipeline_mode<synchronous>, transform_indices = @transform_0, window_bounds = array<i64: 8, 128>}, {pipeline_mode = #tpu.pipeline_mode<synchronous>, transform_indices = @transform_1, window_bounds = array<i64: 8, 128>}]} {
    %c0 = arith.constant 0 : index
    %c0_0 = arith.constant 0 : index
    %0 = vector.load %arg1[%c0, %c0_0] : memref<8x128xf32, #tpu.memory_space<vmem>>, vector<8x128xf32>
    %cst = arith.constant 1.000000e+00 : f32
    %1 = vector.broadcast %cst : f32 to vector<8x128xf32>
    %2 = arith.addf %0, %1 : vector<8x128xf32>
    %c0_1 = arith.constant 0 : index
    %c0_2 = arith.constant 0 : index
    %3 = vector.load %arg2[%c0_1, %c0_2] : memref<8x128xf32, #tpu.memory_space<vmem>>, vector<8x128xf32>
    tpu.vector_store %arg2[%c0_1, %c0_2], %2 {strides = array<i32>} : memref<8x128xf32, #tpu.memory_space<vmem>>, vector<8x128xf32>,
    return
  }
  func.func @transform_0(%arg0: i32) -> (i32, i32) {
    %c0_i32 = arith.constant 0 : i32
    %c0_i32_0 = arith.constant 0 : i32
    %c0_i32_1 = arith.constant 0 : i32
    return %c0_i32, %c0_i32_0 : i32, i32
  }
  func.func @transform_1(%arg0: i32) -> (i32, i32) {
    %c0_i32 = arith.constant 0 : i32
    %c0_i32_0 = arith.constant 0 : i32
    %c0_i32_1 = arith.constant 0 : i32
    return %c0_i32, %c0_i32_0 : i32, i32
  }
}

module attributes {stable_mosaic.version = 11 : i64} {
  func.func @conv_stem_kernel(%arg0: i32, %arg1: i32, %arg2: memref<1x10x4xf32, #tpu.memory_space<vmem>>, %arg3: memref<1x10x4xf32, #tpu.memory_space<vmem>>, %arg4: memref<3x4x32xbf16, #tpu.memory_space<vmem>>, %arg5: memref<1x32xf32, #tpu.memory_space<vmem>>, %arg6: memref<3x32x32xbf16, #tpu.memory_space<vmem>>, %arg7: memref<1x32xf32, #tpu.memory_space<vmem>>, %arg8: memref<8x32xf32, #tpu.memory_space<vmem>>, %arg9: memref<1x8x32xf32, #tpu.memory_space<vmem>>) attributes {dimension_semantics = [#tpu.dimension_semantics<parallel>, #tpu.dimension_semantics<parallel>], iteration_bounds = array<i64: 2, 1>, scalar_prefetch = 0 : i64, scratch_operands = 0 : i64, tpu.core_type = #tpu.core_type<tc>, window_params = [{transform_indices = @transform_0, window_bounds = array<i64: 1, 10, 4>}, {transform_indices = @transform_1, window_bounds = array<i64: 1, 10, 4>}, {pipeline_mode = #tpu.pipeline_mode<synchronous>, transform_indices = @transform_2, window_bounds = array<i64: 3, 4, 32>}, {pipeline_mode = #tpu.pipeline_mode<synchronous>, transform_indices = @transform_3, window_bounds = array<i64: 1, 32>}, {pipeline_mode = #tpu.pipeline_mode<synchronous>, transform_indices = @transform_4, window_bounds = array<i64: 3, 32, 32>}, {pipeline_mode = #tpu.pipeline_mode<synchronous>, transform_indices = @transform_5, window_bounds = array<i64: 1, 32>}, {transform_indices = @transform_6, window_bounds = array<i64: 8, 32>}, {transform_indices = @transform_7, window_bounds = array<i64: 1, 8, 32>}]} {
    %c8_i32 = arith.constant 8 : i32
    %0 = arith.muli %arg1, %c8_i32 : i32
    %1 = tpu.assume_multiple %0, 8 : i32
    %c1_i32 = arith.constant 1 : i32
    %2 = arith.addi %1, %c1_i32 : i32
    %c0 = arith.constant 0 : index
    %3 = arith.index_cast %2 : i32 to index
    %c0_0 = arith.constant 0 : index
    %4 = vector.load %arg2[%c0, %3, %c0_0] : memref<1x10x4xf32, #tpu.memory_space<vmem>>, vector<1x9x4xf32>
    %5 = vector.shape_cast %4 : vector<1x9x4xf32> to vector<9x4xf32>
    %c1_i32_1 = arith.constant 1 : i32
    %6 = arith.addi %1, %c1_i32_1 : i32
    %c0_2 = arith.constant 0 : index
    %7 = arith.index_cast %6 : i32 to index
    %c0_3 = arith.constant 0 : index
    %8 = vector.load %arg3[%c0_2, %7, %c0_3] : memref<1x10x4xf32, #tpu.memory_space<vmem>>, vector<1x9x4xf32>
    %9 = vector.shape_cast %8 : vector<1x9x4xf32> to vector<9x4xf32>
    %c0_4 = arith.constant 0 : index
    %10 = arith.index_cast %1 : i32 to index
    %c0_5 = arith.constant 0 : index
    %11 = vector.load %arg3[%c0_4, %10, %c0_5] : memref<1x10x4xf32, #tpu.memory_space<vmem>>, vector<1x9x4xf32>
    %12 = vector.shape_cast %11 : vector<1x9x4xf32> to vector<9x4xf32>
    %13 = vector.extract_strided_slice %5 {offsets = [0, 0], sizes = [8, 4], strides = [1, 1]} : vector<9x4xf32> to vector<8x4xf32>
    %14 = arith.truncf %13 : vector<8x4xf32> to vector<8x4xbf16>
    %15 = vector.extract_strided_slice %9 {offsets = [0, 0], sizes = [8, 4], strides = [1, 1]} : vector<9x4xf32> to vector<8x4xf32>
    %16 = arith.truncf %15 : vector<8x4xf32> to vector<8x4xbf16>
    %17 = vector.extract_strided_slice %5 {offsets = [1, 0], sizes = [8, 4], strides = [1, 1]} : vector<9x4xf32> to vector<8x4xf32>
    %18 = arith.truncf %17 : vector<8x4xf32> to vector<8x4xbf16>
    %c0_6 = arith.constant 0 : index
    %c0_7 = arith.constant 0 : index
    %c0_8 = arith.constant 0 : index
    %19 = vector.load %arg4[%c0_6, %c0_7, %c0_8] : memref<3x4x32xbf16, #tpu.memory_space<vmem>>, vector<1x4x32xbf16>
    %20 = vector.shape_cast %19 : vector<1x4x32xbf16> to vector<4x32xbf16>
    %cst = arith.constant dense<0.000000e+00> : vector<8x32xf32>
    %21 = tpu.matmul %14, %20, %cst {dimension_numbers = #tpu.dot_dimension_numbers<[1], [0], [0], [1], [0, 0, 1, 1], [], []>} : vector<8x4xbf16>, vector<4x32xbf16>, vector<8x32xf32> -> vector<8x32xf32>
    %c1 = arith.constant 1 : index
    %c0_9 = arith.constant 0 : index
    %c0_10 = arith.constant 0 : index
    %22 = vector.load %arg4[%c1, %c0_9, %c0_10] : memref<3x4x32xbf16, #tpu.memory_space<vmem>>, vector<1x4x32xbf16>
    %23 = vector.shape_cast %22 : vector<1x4x32xbf16> to vector<4x32xbf16>
    %cst_11 = arith.constant dense<0.000000e+00> : vector<8x32xf32>
    %24 = tpu.matmul %16, %23, %cst_11 {dimension_numbers = #tpu.dot_dimension_numbers<[1], [0], [0], [1], [0, 0, 1, 1], [], []>} : vector<8x4xbf16>, vector<4x32xbf16>, vector<8x32xf32> -> vector<8x32xf32>
    %25 = arith.addf %21, %24 : vector<8x32xf32>
    %c2 = arith.constant 2 : index
    %c0_12 = arith.constant 0 : index
    %c0_13 = arith.constant 0 : index
    %26 = vector.load %arg4[%c2, %c0_12, %c0_13] : memref<3x4x32xbf16, #tpu.memory_space<vmem>>, vector<1x4x32xbf16>
    %27 = vector.shape_cast %26 : vector<1x4x32xbf16> to vector<4x32xbf16>
    %cst_14 = arith.constant dense<0.000000e+00> : vector<8x32xf32>
    %28 = tpu.matmul %18, %27, %cst_14 {dimension_numbers = #tpu.dot_dimension_numbers<[1], [0], [0], [1], [0, 0, 1, 1], [], []>} : vector<8x4xbf16>, vector<4x32xbf16>, vector<8x32xf32> -> vector<8x32xf32>
    %29 = arith.addf %25, %28 : vector<8x32xf32>
    %c0_15 = arith.constant 0 : index
    %c0_16 = arith.constant 0 : index
    %30 = vector.load %arg5[%c0_15, %c0_16] : memref<1x32xf32, #tpu.memory_space<vmem>>, vector<1x32xf32>
    %31 = vector.broadcast %30 : vector<1x32xf32> to vector<8x32xf32>
    %32 = arith.addf %29, %31 : vector<8x32xf32>
    %cst_17 = arith.constant 5.000000e-01 : f32
    %33 = vector.broadcast %cst_17 : f32 to vector<8x32xf32>
    %34 = arith.mulf %33, %32 : vector<8x32xf32>
    %cst_18 = arith.constant 0.707106769 : f32
    %35 = vector.broadcast %cst_18 : f32 to vector<8x32xf32>
    %36 = arith.mulf %32, %35 : vector<8x32xf32>
    %37 = math.erf %36 : vector<8x32xf32>
    %cst_19 = arith.constant 1.000000e+00 : f32
    %38 = vector.broadcast %cst_19 : f32 to vector<8x32xf32>
    %39 = arith.addf %38, %37 : vector<8x32xf32>
    %40 = arith.mulf %34, %39 : vector<8x32xf32>
    %41 = arith.truncf %12 : vector<9x4xf32> to vector<9x4xbf16>
    %c0_20 = arith.constant 0 : index
    %c0_21 = arith.constant 0 : index
    %c0_22 = arith.constant 0 : index
    %42 = vector.load %arg4[%c0_20, %c0_21, %c0_22] : memref<3x4x32xbf16, #tpu.memory_space<vmem>>, vector<1x4x32xbf16>
    %43 = vector.shape_cast %42 : vector<1x4x32xbf16> to vector<4x32xbf16>
    %cst_23 = arith.constant dense<0.000000e+00> : vector<9x32xf32>
    %44 = tpu.matmul %41, %43, %cst_23 {dimension_numbers = #tpu.dot_dimension_numbers<[1], [0], [0], [1], [0, 0, 1, 1], [], []>} : vector<9x4xbf16>, vector<4x32xbf16>, vector<9x32xf32> -> vector<9x32xf32>
    %45 = arith.truncf %5 : vector<9x4xf32> to vector<9x4xbf16>
    %c1_24 = arith.constant 1 : index
    %c0_25 = arith.constant 0 : index
    %c0_26 = arith.constant 0 : index
    %46 = vector.load %arg4[%c1_24, %c0_25, %c0_26] : memref<3x4x32xbf16, #tpu.memory_space<vmem>>, vector<1x4x32xbf16>
    %47 = vector.shape_cast %46 : vector<1x4x32xbf16> to vector<4x32xbf16>
    %cst_27 = arith.constant dense<0.000000e+00> : vector<9x32xf32>
    %48 = tpu.matmul %45, %47, %cst_27 {dimension_numbers = #tpu.dot_dimension_numbers<[1], [0], [0], [1], [0, 0, 1, 1], [], []>} : vector<9x4xbf16>, vector<4x32xbf16>, vector<9x32xf32> -> vector<9x32xf32>
    %49 = arith.addf %44, %48 : vector<9x32xf32>
    %50 = arith.truncf %9 : vector<9x4xf32> to vector<9x4xbf16>
    %c2_28 = arith.constant 2 : index
    %c0_29 = arith.constant 0 : index
    %c0_30 = arith.constant 0 : index
    %51 = vector.load %arg4[%c2_28, %c0_29, %c0_30] : memref<3x4x32xbf16, #tpu.memory_space<vmem>>, vector<1x4x32xbf16>
    %52 = vector.shape_cast %51 : vector<1x4x32xbf16> to vector<4x32xbf16>
    %cst_31 = arith.constant dense<0.000000e+00> : vector<9x32xf32>
    %53 = tpu.matmul %50, %52, %cst_31 {dimension_numbers = #tpu.dot_dimension_numbers<[1], [0], [0], [1], [0, 0, 1, 1], [], []>} : vector<9x4xbf16>, vector<4x32xbf16>, vector<9x32xf32> -> vector<9x32xf32>
    %54 = arith.addf %49, %53 : vector<9x32xf32>
    %c0_32 = arith.constant 0 : index
    %c0_33 = arith.constant 0 : index
    %55 = vector.load %arg5[%c0_32, %c0_33] : memref<1x32xf32, #tpu.memory_space<vmem>>, vector<1x32xf32>
    %56 = vector.broadcast %55 : vector<1x32xf32> to vector<9x32xf32>
    %57 = arith.addf %54, %56 : vector<9x32xf32>
    %cst_34 = arith.constant 5.000000e-01 : f32
    %58 = vector.broadcast %cst_34 : f32 to vector<9x32xf32>
    %59 = arith.mulf %58, %57 : vector<9x32xf32>
    %cst_35 = arith.constant 0.707106769 : f32
    %60 = vector.broadcast %cst_35 : f32 to vector<9x32xf32>
    %61 = arith.mulf %57, %60 : vector<9x32xf32>
    %62 = math.erf %61 : vector<9x32xf32>
    %cst_36 = arith.constant 1.000000e+00 : f32
    %63 = vector.broadcast %cst_36 : f32 to vector<9x32xf32>
    %64 = arith.addf %63, %62 : vector<9x32xf32>
    %65 = arith.mulf %59, %64 : vector<9x32xf32>
    %66 = tpu.iota {dimensions = array<i32: 0>} : vector<9x1xi32>
    %c1_i32_37 = arith.constant 1 : i32
    %67 = arith.subi %1, %c1_i32_37 : i32
    %68 = vector.broadcast %67 : i32 to vector<9x1xi32>
    %69 = arith.addi %68, %66 : vector<9x1xi32>
    %c0_i32 = arith.constant 0 : i32
    %70 = vector.broadcast %c0_i32 : i32 to vector<9x1xi32>
    %71 = arith.cmpi sge, %69, %70 : vector<9x1xi32>
    %cst_38 = arith.constant 0.000000e+00 : f32
    %72 = vector.shape_cast %71 : vector<9x1xi1> to vector<9x1xi1>
    %73 = vector.broadcast %72 : vector<9x1xi1> to vector<9x32xi1>
    %74 = vector.broadcast %cst_38 : f32 to vector<9x32xf32>
    %75 = arith.select %73, %65, %74 : vector<9x32xi1>, vector<9x32xf32>
    %76 = vector.extract_strided_slice %75 {offsets = [0, 0], sizes = [8, 32], strides = [1, 1]} : vector<9x32xf32> to vector<8x32xf32>
    %77 = arith.truncf %76 : vector<8x32xf32> to vector<8x32xbf16>
    %c0_39 = arith.constant 0 : index
    %c0_40 = arith.constant 0 : index
    %c0_41 = arith.constant 0 : index
    %78 = vector.load %arg6[%c0_39, %c0_40, %c0_41] : memref<3x32x32xbf16, #tpu.memory_space<vmem>>, vector<1x32x32xbf16>
    %79 = vector.shape_cast %78 : vector<1x32x32xbf16> to vector<32x32xbf16>
    %cst_42 = arith.constant dense<0.000000e+00> : vector<8x32xf32>
    %80 = tpu.matmul %77, %79, %cst_42 {dimension_numbers = #tpu.dot_dimension_numbers<[1], [0], [0], [1], [0, 0, 1, 1], [], []>} : vector<8x32xbf16>, vector<32x32xbf16>, vector<8x32xf32> -> vector<8x32xf32>
    %81 = arith.truncf %40 : vector<8x32xf32> to vector<8x32xbf16>
    %c1_43 = arith.constant 1 : index
    %c0_44 = arith.constant 0 : index
    %c0_45 = arith.constant 0 : index
    %82 = vector.load %arg6[%c1_43, %c0_44, %c0_45] : memref<3x32x32xbf16, #tpu.memory_space<vmem>>, vector<1x32x32xbf16>
    %83 = vector.shape_cast %82 : vector<1x32x32xbf16> to vector<32x32xbf16>
    %cst_46 = arith.constant dense<0.000000e+00> : vector<8x32xf32>
    %84 = tpu.matmul %81, %83, %cst_46 {dimension_numbers = #tpu.dot_dimension_numbers<[1], [0], [0], [1], [0, 0, 1, 1], [], []>} : vector<8x32xbf16>, vector<32x32xbf16>, vector<8x32xf32> -> vector<8x32xf32>
    %85 = arith.addf %80, %84 : vector<8x32xf32>
    %86 = vector.extract_strided_slice %75 {offsets = [1, 0], sizes = [8, 32], strides = [1, 1]} : vector<9x32xf32> to vector<8x32xf32>
    %87 = arith.truncf %86 : vector<8x32xf32> to vector<8x32xbf16>
    %c2_47 = arith.constant 2 : index
    %c0_48 = arith.constant 0 : index
    %c0_49 = arith.constant 0 : index
    %88 = vector.load %arg6[%c2_47, %c0_48, %c0_49] : memref<3x32x32xbf16, #tpu.memory_space<vmem>>, vector<1x32x32xbf16>
    %89 = vector.shape_cast %88 : vector<1x32x32xbf16> to vector<32x32xbf16>
    %cst_50 = arith.constant dense<0.000000e+00> : vector<8x32xf32>
    %90 = tpu.matmul %87, %89, %cst_50 {dimension_numbers = #tpu.dot_dimension_numbers<[1], [0], [0], [1], [0, 0, 1, 1], [], []>} : vector<8x32xbf16>, vector<32x32xbf16>, vector<8x32xf32> -> vector<8x32xf32>
    %91 = arith.addf %85, %90 : vector<8x32xf32>
    %c0_51 = arith.constant 0 : index
    %c0_52 = arith.constant 0 : index
    %92 = vector.load %arg7[%c0_51, %c0_52] : memref<1x32xf32, #tpu.memory_space<vmem>>, vector<1x32xf32>
    %93 = vector.broadcast %92 : vector<1x32xf32> to vector<8x32xf32>
    %94 = arith.addf %91, %93 : vector<8x32xf32>
    %cst_53 = arith.constant 5.000000e-01 : f32
    %95 = vector.broadcast %cst_53 : f32 to vector<8x32xf32>
    %96 = arith.mulf %95, %94 : vector<8x32xf32>
    %cst_54 = arith.constant 0.707106769 : f32
    %97 = vector.broadcast %cst_54 : f32 to vector<8x32xf32>
    %98 = arith.mulf %94, %97 : vector<8x32xf32>
    %99 = math.erf %98 : vector<8x32xf32>
    %cst_55 = arith.constant 1.000000e+00 : f32
    %100 = vector.broadcast %cst_55 : f32 to vector<8x32xf32>
    %101 = arith.addf %100, %99 : vector<8x32xf32>
    %102 = arith.mulf %96, %101 : vector<8x32xf32>
    %c0_56 = arith.constant 0 : index
    %c0_57 = arith.constant 0 : index
    %103 = vector.load %arg8[%c0_56, %c0_57] : memref<8x32xf32, #tpu.memory_space<vmem>>, vector<8x32xf32>
    %104 = arith.addf %102, %103 : vector<8x32xf32>
    %c0_58 = arith.constant 0 : index
    %c0_59 = arith.constant 0 : index
    %c0_60 = arith.constant 0 : index
    %105 = vector.load %arg9[%c0_58, %c0_59, %c0_60] : memref<1x8x32xf32, #tpu.memory_space<vmem>>, vector<1x8x32xf32>
    %106 = vector.shape_cast %105 : vector<1x8x32xf32> to vector<8x32xf32>
    %107 = vector.shape_cast %104 : vector<8x32xf32> to vector<1x8x32xf32>
    tpu.vector_store %arg9[%c0_58, %c0_59, %c0_60], %107 {strides = array<i32>} : memref<1x8x32xf32, #tpu.memory_space<vmem>>, vector<1x8x32xf32>,
    return
  }
  func.func @transform_0(%arg0: i32, %arg1: i32) -> (i32, i32, i32) {
    %c0_i32 = arith.constant 0 : i32
    %c0_i32_0 = arith.constant 0 : i32
    %c0_i32_1 = arith.constant 0 : i32
    return %arg0, %c0_i32, %c0_i32_0 : i32, i32, i32
  }
  func.func @transform_1(%arg0: i32, %arg1: i32) -> (i32, i32, i32) {
    %c0_i32 = arith.constant 0 : i32
    %c0_i32_0 = arith.constant 0 : i32
    %c0_i32_1 = arith.constant 0 : i32
    return %arg0, %c0_i32, %c0_i32_0 : i32, i32, i32
  }
  func.func @transform_2(%arg0: i32, %arg1: i32) -> (i32, i32, i32) {
    %c0_i32 = arith.constant 0 : i32
    %c0_i32_0 = arith.constant 0 : i32
    %c0_i32_1 = arith.constant 0 : i32
    %c0_i32_2 = arith.constant 0 : i32
    return %c0_i32, %c0_i32_0, %c0_i32_1 : i32, i32, i32
  }
  func.func @transform_3(%arg0: i32, %arg1: i32) -> (i32, i32) {
    %c0_i32 = arith.constant 0 : i32
    %c0_i32_0 = arith.constant 0 : i32
    %c0_i32_1 = arith.constant 0 : i32
    return %c0_i32, %c0_i32_0 : i32, i32
  }
  func.func @transform_4(%arg0: i32, %arg1: i32) -> (i32, i32, i32) {
    %c0_i32 = arith.constant 0 : i32
    %c0_i32_0 = arith.constant 0 : i32
    %c0_i32_1 = arith.constant 0 : i32
    %c0_i32_2 = arith.constant 0 : i32
    return %c0_i32, %c0_i32_0, %c0_i32_1 : i32, i32, i32
  }
  func.func @transform_5(%arg0: i32, %arg1: i32) -> (i32, i32) {
    %c0_i32 = arith.constant 0 : i32
    %c0_i32_0 = arith.constant 0 : i32
    %c0_i32_1 = arith.constant 0 : i32
    return %c0_i32, %c0_i32_0 : i32, i32
  }
  func.func @transform_6(%arg0: i32, %arg1: i32) -> (i32, i32) {
    %c0_i32 = arith.constant 0 : i32
    %c0_i32_0 = arith.constant 0 : i32
    return %arg1, %c0_i32 : i32, i32
  }
  func.func @transform_7(%arg0: i32, %arg1: i32) -> (i32, i32, i32) {
    %c0_i32 = arith.constant 0 : i32
    %c0_i32_0 = arith.constant 0 : i32
    return %arg0, %arg1, %c0_i32 : i32, i32, i32
  }
}

</mosaic_0001>

<bundles_post_ra>
// kernel: tpu_custom_call.1
= control target key start
LH: loop header
LB: loop body
LE: loop exit
PB: predicated region body
PF: predicated region fallthrough
CT: control target
= control target key end

     0   :  { %6 = vsyncpa [#allocation3], 0  ;;  %s115_s0 = inlined_call_operand.hbm [shape: f32[8,128], index: 0, kind: input, shape index: {}]   ;;  %s116_s1 = inlined_call_operand.hbm [shape: f32[8,128], index: 1, kind: output, shape index: {}]  }
   0x1   :  { %7 = vsyncpa [#allocation4], 0  ;;  %s13_s8 = sshll.u32 %s115_s0, 4  ;;  %s97_s9 = smov [#allocation2]   ;;  %s14_s8 = int_to_ptr.hbm [resolvable:$true] %s13_s8 }
   0x2   :  { %s15_s10 = sshll.u32 %s97_s9, 4  ;;  %s16_s10 = int_to_ptr.vmem [resolvable:$true] %s15_s10 }
   0x3   :  { %18 = dma.hbm_to_vmem [thread:$0]  %s14_s8, 128, %s16_s10, [#allocation3]  }
   0x4   :  { %93 = dma.done.wait [#allocation3], 128  }
   0x5   :  { %94 = vsyncadd [#allocation3], 4294967168  ;;  %s98_s11 = smov [#allocation5]   ;;  %s33_s15 = sshll.u32 %s116_s1, 4  ;;  %v23_v0 = vld [vmem:[#allocation2] sm:$0xff]  ;;  %s34_s15 = int_to_ptr.hbm [resolvable:$true] %s33_s15 }
   0x6   :  { %s31_s12 = sshll.u32 %s98_s11, 4  ;;  %v24_v1 = vadd.f32 1.0, %v23_v0  ;;  %s32_s12 = int_to_ptr.vmem [resolvable:$true] %s31_s12 }
   0x8   :  { %25 = vst [vmem:[#allocation5] sm:$0xff] %v24_v1 }
   0x9   :  { %36 = dma.vmem_to_hbm [thread:$0]  %s32_s12, 128, %s34_s15, [#allocation4]  }
   0xa   :  { %95 = dma.done.wait [#allocation4], 128  }
   0xb   :  { %96 = vsyncadd [#allocation4], 4294967168 }
   0xc   :  { %41 = vsyncpa [#allocation3], 1 }
   0xd   :  { %42 = vsyncpa [#allocation4], 1 }

// kernel: tpu_custom_call.1
= control target key start
LH: loop header
LB: loop body
LE: loop exit
PB: predicated region body
PF: predicated region fallthrough
CT: control target
= control target key end

     0   :  { %12 = vsyncpa [#allocation3], 0  ;;  %s1373_s0 = inlined_call_operand.vmem [shape: f32[2,10,4], index: 0, kind: input, shape index: {}]   ;;  %s1374_s1 = inlined_call_operand.vmem [shape: f32[2,10,4], index: 1, kind: input, shape index: {}]   ;;  %s1375_s2 = inlined_call_operand.vmem [shape: bf16[3,4,32], index: 2, kind: input, shape index: {}]   ;;  %s1376_s3 = inlined_call_operand.vmem [shape: f32[1,32], index: 3, kind: input, shape index: {}]   ;;  %s1377_s4 = inlined_call_operand.vmem [shape: bf16[3,32,32], index: 4, kind: input, shape index: {}]   ;;  %s1378_s5 = inlined_call_operand.vmem [shape: f32[1,32], index: 5, kind: input, shape index: {}]   ;;  %s1379_s6 = inlined_call_operand.vmem [shape: f32[8,32], index: 6, kind: input, shape index: {}]   ;;  %s1380_s7 = inlined_call_operand.hbm [shape: f32[2,8,32], index: 7, kind: output, shape index: {}]  }
   0x1   :  { %14 = vsyncpa [#allocation3 + $0x1], 0  ;;  %s1164_s24 = smov 0   ;;  %s1166_s25 = smov 0  }
   0x2   :  { %s1168_s26 = smov 0   ;;  %s1170_s27 = smov 0  }
   0x3   :  { %s1172_s28 = smov 0   ;;  %s1174_s29 = smov 0  }
   0x4 LB: > { %s905_s30 = sadd.s32 4294967295, %s1122_s29   ;;  %s906_s8 = sadd.s32 4294967294, %s1122_s29   ;;  %s1122_s29 = sphi %s1174_s29, %s20_s29   ;;  %s1118_s28 = sphi %s1172_s28, %s1387_s28   ;;  %s1114_s27 = sphi %s1170_s27, %s1386_s27   ;;  %s1110_s26 = sphi %s1168_s26, %s1385_s26   ;;  %s1106_s25 = sphi %s1166_s25, %s1384_s25   ;;  %s1102_s24 = sphi %s1164_s24, %s1383_s24  }
   0x5   : > { %s32_s9 = sadd.s32 1, %s1118_s28  ;;  %s203_s10 = sadd.s32 1, %s1110_s26 }
   0x6   : > { %p34_p0 = scmp.ge.s32.totalorder %s32_s9, 2  ;;  %p213_p1 = scmp.ne.s32.totalorder %s1110_s26, %s1106_s25 }
   0x7   : > { %p214_p2 = scmp.eq.s32.totalorder %s905_s30, 1  ;;  %p219_p3 = scmp.ne.s32.totalorder %s1106_s25, %s1102_s24 }
   0x8   : > { %s1389_s9 = smov (%p34_p0, %s32_s9), 0  ;;  %p220_p5 = scmp.eq.s32.totalorder %s906_s8, 1 }
   0x9   : > { %p1204_p4 = por %p214_p2, %p213_p1  ;;  %s198_s12 = ssub.s32 %s1118_s28, %s1389_s9 }
   0xa   : > { %p910_p6 = scmp.ge.s32.totalorder %s1122_s29, 1  ;;  %p201_p7 = scmp.eq.s32.totalorder %s198_s12, 0 }
   0xb   : > { %p1211_p8 = por %p220_p5, %p219_p3  ;;  %p273_p9 = scmp.lt.s32.totalorder %s1122_s29, 3 }
   0xc   : > { %s1217_s14 = scalar_select %p201_p7, %s1110_s26, %s203_s10  }
   0xd   : > { %p274_p10 = pnand %p910_p6, %p273_p9 }
   0xe   : > { %p314_p11 = scmp.lt.s32.totalorder (!%p274_p10), %s1114_s27, 1  ;;  %s311_s19 = sand.u32 (!%p274_p10), 1, %s1106_s25  }
   0xf   : > { %277 = sbr.rel (%p274_p10) target bundleno = 428 (0x1ac), region = 48  ;;  %s911_s20 = sshll.u32 (!%p274_p10), %s311_s19, 3 }
  0x10   : > { %s313_s12 = scalar_lea.vmem (!%p274_p10), [#allocation2], %s911_s20  ;;  %s1064_s20 = scalar_lea.hbm (!%p274_p10), %s1380_s7, 16 }
  0x14   : > { %v920_v0 = vld [vmem:[%s1375_s2 + $0x2] sm:$0x3]  ;;  %vm350_vm0 = vcmask 1041408   ;;  %v343_v1 = vld [vmem:[%s1375_s2] sm:$0x3]  ;;  %s315_s21 = scalar_select %p314_p11, %s1114_s27, 1 }
  0x15   : > { %v352_v2 = vsel %vm350_vm0, %v920_v0, 0  ;;  %v371_v3 = vsel %vm350_vm0, %v343_v1, 0  ;;  %v923_v4 = vld [vmem:[%s1375_s2 + $0x4] sm:$0x3]  ;;  %vm346_vm1 = vcmask 31744   ;;  %vm646_vm10 = vcmask 261120  }
  0x16   : > { %361 = vmatpush.bf16.msra.mxu0 %v352_v2  ;;  %380 = vmatpush.bf16.msra.mxu1 %v371_v3  ;;  %v399_v5 = vsel %vm350_vm0, %v923_v4, 0  ;;  %s971_s22 = sshll.u32 %s315_s21, 4  ;;  %v1034_v26 = vld [vmem:[%s1376_s3] ss:$0 sm:$0xff]  ;;  %s968_s21 = sshll.u32 %s1114_s27, 3 }
  0x17   : > { %474 = vmatpush.bf16.msra.mxu3 %v352_v2  ;;  %408 = vmatpush.bf16.msra.mxu2 %v399_v5  ;;  %s323_s8 = scalar_lea.vmem %s1374_s1, %s971_s22  ;;  %s318_s15 = scalar_lea.vmem %s1373_s0, %s971_s22 }
  0x18   : > { %v918_v6 = vld [vmem:[%s323_s8 + $0x1] sm:$0xff]  ;;  %v917_v10 = vld [vmem:[%s318_s15 + $0x9] sm:$0x1]  ;;  %s797_s30 = scalar_lea.hbm %s1380_s7, %s968_s21  ;;  %s786_s27 = scalar_lea.sflag [#allocation3], %s311_s19 }
  0x19   : > { %v916_v7 = vld [vmem:[%s318_s15 + $0x1] sm:$0xff]  ;;  %v341_v8 = vpack.c.bf16 %v918_v6, %v918_v6  ;;  %v919_v16 = vld [vmem:[%s323_s8 + $0x9] sm:$0x1]  ;;  %s799_s15 = sshll.u32 %s313_s12, 4  ;;  %s801_s16 = sshll.u32 %s797_s30, 4  ;;  %s800_s15 = int_to_ptr.vmem [resolvable:$true] %s799_s15  ;;  %s802_s16 = int_to_ptr.hbm [resolvable:$true] %s801_s16 }
  0x1a   : > { %491 = vmatpush.bf16.msrb.mxu0 %v371_v3  ;;  %509 = vmatpush.bf16.msrb.mxu1 %v399_v5  ;;  %v340_v9 = vpack.c.bf16 %v916_v7, %v916_v7  ;;  %v342_v11 = vpack.c.bf16 %v917_v10, %v916_v7  ;;  %v338_v17 = vld [vmem:[%s323_s8] sm:$0xff]  ;;  %v339_v18 = vld [vmem:[%s323_s8 + $0x8] sm:$0x1]  ;;  %v498_v19 = vpack.c.bf16 %v919_v16, %v918_v6  ;;  %v976_v6 = vld [vmem:[%s1377_s4 + $0x18] sm:$0xff]  ;;  %s1058_s17 = sshra.s32 %s802_s16, 4  ;;  %s1059_s17 = int_to_ptr.hbm [resolvable:$true] %s1058_s17 }
  0x1b   : > { %921 = vmatmul.msk.bf16.vlgmr.msra.gmra.mxu0 %vm346_vm1, %v341_v8  ;;  %v464_v20 = vpack.c.bf16 %v339_v18, %v338_v17  ;;  %656 = vmatpush.bf16.msrb.mxu2 %v976_v6  ;;  %v977_v6 = vld [vmem:[%s1377_s4 + $0x20] sm:$0xff]  ;;  %s1060_s18 = scalar_lea.hbm %s1059_s17, 8  ;;  %p1065_p1 = scmp.lt.s32.totalorder %s1059_s17, %s1380_s7 }
  0x1c   : > { %922 = vmatmul.msk.bf16.vlgmr.msra.gmra.mxu1 %vm346_vm1, %v340_v9  ;;  %926 = vmatmul.msk.bf16.vlgmr.msra.gmra.mxu3 %vm346_vm1, %v342_v11  ;;  %v389_v12 = vshrl.u32 %v342_v11, 16  ;;  %v391_v13 = vshll.u32 %v342_v11, 16  ;;  %p1061_p12 = scmp.ne.s32.totalorder %s1059_s17, %s1060_s18  ;;  %p1066_p2 = scmp.lt.s32.totalorder %s1064_s20, %s1060_s18 }
  0x1e   : > { %v393_v14 = vrot.slane %v391_v13, 1  ;;  %p1062_p13 = pnand %p1061_p12, %p1204_p4  ;;  %p1067_p3 = por %p1066_p2, %p1065_p1 }
  0x20   : > { %v394_v15 = vor.u32 %v393_v14, %v389_v12  ;;  %p1063_p0 = pneg %p1062_p13 }
  0x22   : > { %924 = vmatmul.msk.bf16.vlgmr.msra.gmra.mxu2 %vm346_vm1, %v394_v15  ;;  %v975_v15 = vld [vmem:[%s1377_s4 + $0x10] sm:$0xff]  ;;  %p1068_p5 = pnand %p1067_p3, %p1063_p0 }
  0x23   : > { %657 = vmatpush.bf16.msrb.mxu2 %v975_v15 }
  0x2b   : > { %927 = vmatmul.msk.bf16.vlgmr.msrb.gmra.mxu0 %vm346_vm1, %v464_v20 }
  0x2c   : > { %928 = vmatmul.msk.bf16.vlgmr.msrb.gmra.mxu1 %vm346_vm1, %v498_v19 }
  0x98   : > { %v363_v21 = vpop.f32.mrf.mxu0 }
  0x99   : > { %v382_v22 = vpop.f32.mrf.mxu1 }
  0x9a   : > { %v383_v25 = vadd.f32 %v382_v22, %v363_v21 }
  0x9f   : > { %v476_v28 = vpop.f32.mrf.mxu3 }
  0xa0   : > { %v365_v23 = vpop.f32.mrf.mxu0 }
  0xa1   : > { %v384_v24 = vpop.f32.mrf.mxu1  ;;  %v974_v23 = vld [vmem:[%s1377_s4 + $0x8] sm:$0xff] }
  0xa2   : > { %684 = vmatpush.bf16.msrb.mxu3 %v974_v23 }
  0xa5   : > { %v410_v27 = vpop.f32.mrf.mxu2 }
  0xa6   : > { %v414_v29 = vadd.f32 %v410_v27, %v383_v25 }
  0xa7   : > { %v478_v43 = vpop.f32.mrf.mxu3 }
  0xa8   : > { %v1245_v30 = vadd.f32 %v1034_v26, %v414_v29  ;;  %v493_v31 = vpop.f32.mrf.mxu0 }
  0xa9   : > { %v511_v32 = vpop.f32.mrf.mxu1  ;;  %v494_v33 = vadd.f32 %v493_v31, %v476_v28  ;;  %v973_v31 = vld [vmem:[%s1377_s4] sm:$0xff] }
  0xaa   : > { %v1248_v34 = vmul.f32 0.70710677, %v1245_v30  ;;  %685 = vmatpush.bf16.msrb.mxu3 %v973_v31 }
  0xab   : > { %v516_v35 = vadd.f32 %v511_v32, %v494_v33 }
  0xac   : > { %v422_v36 = vmul.f32 %v1248_v34, %v1248_v34 }
  0xad   : > { %v1252_v37 = vadd.f32 %v1034_v26, %v516_v35  ;;  %v412_v38 = vpop.f32.mrf.mxu2 }
  0xae   : > { %v1254_v39 = vmin.f32 %v422_v36, 16.0 }
  0xaf   : > { %v1257_v40 = vmul.f32 0.70710677, %v1252_v37  ;;  %v520_v31 = vmul.f32 0.5, %v1252_v37 }
  0xb0   : > { %v424_v41 = vmul.f32 2.1237322e-06, %v1254_v39  ;;  %v435_v42 = vmul.f32 3.8918573e-05, %v1254_v39  ;;  %v495_v44 = vpop.f32.mrf.mxu0 }
  0xb1   : > { %v524_v45 = vmul.f32 %v1257_v40, %v1257_v40  ;;  %v496_v46 = vadd.f32 %v495_v44, %v478_v43  ;;  %v513_v49 = vpop.f32.mrf.mxu1 }
  0xb2   : > { %v425_v47 = vadd.f32 0.00028619796, %v424_v41  ;;  %v436_v48 = vadd.f32 0.001143296, %v435_v42 }
  0xb3   : > { %v1263_v50 = vmin.f32 %v524_v45, 16.0  ;;  %v517_v51 = vadd.f32 %v513_v49, %v496_v46 }
  0xb4   : > { %v426_v52 = vmul.f32 %v425_v47, %v1254_v39  ;;  %v437_v53 = vmul.f32 %v436_v48, %v1254_v39 }
  0xb5   : > { %v526_v54 = vmul.f32 2.1237322e-06, %v1263_v50  ;;  %v537_v55 = vmul.f32 3.8918573e-05, %v1263_v50  ;;  %v1269_v56 = vadd.f32 %v1034_v26, %v517_v51 }
  0xb6   : > { %v427_v57 = vadd.f32 0.0036580483, %v426_v52  ;;  %v438_v58 = vadd.f32 0.014752088, %v437_v53 }
  0xb7   : > { %v527_v59 = vadd.f32 0.00028619796, %v526_v54  ;;  %v538_v60 = vadd.f32 0.001143296, %v537_v55  ;;  %v1273_v62 = vmul.f32 0.70710677, %v1269_v56 }
  0xb8   : > { %v439_v61 = vmul.f32 %v438_v58, %v1254_v39  ;;  %v428_v63 = vmul.f32 %v427_v57, %v1254_v39  ;;  %v978_v55 = vld [vmem:[%s1377_s4 + $0x28] sm:$0xff]  ;;  %v608_v58 = vlaneseq }
  0xb9   : > { %v528_v0 = vmul.f32 %v527_v59, %v1263_v50  ;;  %v539_v1 = vmul.f32 %v538_v60, %v1263_v50  ;;  %v564_v3 = vmul.f32 %v1273_v62, %v1273_v62  ;;  %725 = vmatpush.bf16.msra.mxu0 %v978_v55 }
  0xba   : > { %v440_v2 = vadd.f32 0.112945676, %v439_v61  ;;  %v429_v9 = vadd.f32 0.05243302, %v428_v63  ;;  %v609_v15 = vshrl.u32 %v608_v58, 7 }
  0xbb   : > { %v529_v4 = vadd.f32 0.0036580483, %v528_v0  ;;  %v540_v5 = vadd.f32 0.014752088, %v539_v1  ;;  %v1284_v8 = vmin.f32 %v564_v3, 16.0 }
  0xbc   : > { %v441_v7 = vmul.f32 %v440_v2, %v1254_v39  ;;  %v430_v18 = vmul.f32 %v429_v9, %v1254_v39 }
  0xbd   : > { %v541_v10 = vmul.f32 %v540_v5, %v1263_v50  ;;  %v566_v12 = vmul.f32 2.1237322e-06, %v1284_v8  ;;  %v530_v13 = vmul.f32 %v529_v4, %v1263_v50  ;;  %v577_v17 = vmul.f32 3.8918573e-05, %v1284_v8  ;;  %726 = vmatpush.bf16.msra.mxu0 %v977_v6 }
  0xbe   : > { %v442_v11 = vadd.f32 0.4994258, %v441_v7  ;;  %v431_v26 = vadd.f32 0.18741608, %v430_v18  ;;  %v420_v18 = vmul.f32 0.5, %v1245_v30 }
  0xbf   : > { %v542_v14 = vadd.f32 0.112945676, %v541_v10  ;;  %v567_v20 = vadd.f32 0.00028619796, %v566_v12  ;;  %v578_v22 = vadd.f32 0.001143296, %v577_v17 }
  0xc0   : > { %v443_v16 = vmul.f32 %v442_v11, %v1254_v39  ;;  %v531_v24 = vadd.f32 0.05243302, %v530_v13  ;;  %v432_v36 = vmul.f32 %v431_v26, %v1254_v39 }
  0xc1   : > { %v543_v19 = vmul.f32 %v542_v14, %v1263_v50  ;;  %v568_v28 = vmul.f32 %v567_v20, %v1284_v8  ;;  %v579_v29 = vmul.f32 %v578_v22, %v1284_v8 }
  0xc2   : > { %v444_v21 = vadd.f32 1.0, %v443_v16  ;;  %v532_v32 = vmul.f32 %v531_v24, %v1263_v50  ;;  %v433_v46 = vadd.f32 1.1283791, %v432_v36  ;;  %v613_v24 = vadd.s32 4294967295, %v609_v15 }
  0xc3   : > { %v544_v25 = vadd.f32 0.4994258, %v543_v19  ;;  %v580_v35 = vadd.f32 0.014752088, %v579_v29  ;;  %v569_v38 = vadd.f32 0.0036580483, %v568_v28 }
  0xc4   : > { %1036 = vrcp.f32 %v444_v21  ;;  %v533_v44 = vadd.f32 0.18741608, %v532_v32  ;;  %v454_v49 = vand.u32 2147483647, %v444_v21  ;;  %v456_v51 = vand.u32 2147483648, %v444_v21 }
  0xc5   : > { %v545_v27 = vmul.f32 %v544_v25, %v1263_v50  ;;  %v581_v42 = vmul.f32 %v580_v35, %v1284_v8  ;;  %v570_v48 = vmul.f32 %v569_v38, %v1284_v8  ;;  %v434_v60 = vmul.f32 %v433_v46, %v1248_v34 }
  0xc6   : > { %v534_v39 = vmul.f32 %v533_v44, %v1263_v50  ;;  %vm450_vm3 = vweird.f32 %v444_v21  ;;  %vm455_vm5 = vcmp.eq.f32.partialorder %v454_v49, 8.507059e+37  ;;  %v457_v0 = vor.u32 1.1754944e-38, %v456_v51 }
  0xc7   : > { %v546_v33 = vadd.f32 1.0, %v545_v27  ;;  %v582_v45 = vadd.f32 0.112945676, %v581_v42  ;;  %v571_v63 = vadd.f32 0.05243302, %v570_v48  ;;  %vm615_vm11 = vcmp.ge.s32.totalorder %v613_v24, 0 }
  0xc8   : > { %v535_v3 = vadd.f32 1.1283791, %v534_v39  ;;  %v521_v48 = vmul.f32 0.5, %v1269_v56 }
  0xc9   : > { %1038 = vrcp.f32 %v546_v33  ;;  %v583_v52 = vmul.f32 %v582_v45, %v1284_v8  ;;  %v556_v4 = vand.u32 2147483647, %v546_v33  ;;  %v558_v5 = vand.u32 2147483648, %v546_v33 }
  0xca   : > { %v1037_v41 = vpop.eup %1036  ;;  %v572_v11 = vmul.f32 %v571_v63, %v1284_v8  ;;  %vm552_vm7 = vweird.f32 %v546_v33  ;;  %v536_v16 = vmul.f32 %v535_v3, %v1257_v40 }
  0xcb   : > { %v446_v43 = vmul.f32 %v1037_v41, %v444_v21  ;;  %vm451_vm2 = vweird.f32 %v1037_v41  ;;  %v584_v59 = vadd.f32 0.4994258, %v583_v52  ;;  %v559_v14 = vor.u32 1.1754944e-38, %v558_v5 }
  0xcc   : > { %vm452_vm4 = vmor %vm450_vm3, %vm451_vm2  ;;  %vm557_vm9 = vcmp.eq.f32.partialorder %v556_v4, 8.507059e+37  ;;  %v573_v21 = vadd.f32 0.18741608, %v572_v11 }
  0xcd   : > { %v447_v47 = vsub.f32 1.0, %v446_v43  ;;  %v585_v2 = vmul.f32 %v584_v59, %v1284_v8 }
  0xce   : > { %v574_v28 = vmul.f32 %v573_v21, %v1284_v8 }
  0xcf   : > { %v1039_v53 = vpop.eup %1038  ;;  %v448_v54 = vmul.f32 %v1037_v41, %v447_v47  ;;  %v586_v9 = vadd.f32 1.0, %v585_v2 }
  0xd0   : > { %v548_v57 = vmul.f32 %v1039_v53, %v546_v33  ;;  %vm553_vm6 = vweird.f32 %v1039_v53  ;;  %v575_v35 = vadd.f32 1.1283791, %v574_v28 }
  0xd1   : > { %v449_v61 = vadd.f32 %v1037_v41, %v448_v54  ;;  %1040 = vrcp.f32 %v586_v9  ;;  %vm554_vm8 = vmor %vm552_vm7, %vm553_vm6  ;;  %v598_v33 = vand.u32 2147483648, %v586_v9  ;;  %v596_v38 = vand.u32 2147483647, %v586_v9 }
  0xd2   : > { %v549_v1 = vsub.f32 1.0, %v548_v57  ;;  %vm592_vm13 = vweird.f32 %v586_v9  ;;  %v576_v44 = vmul.f32 %v575_v35, %v1273_v62 }
  0xd3   : > { %v453_v50 = vsel %vm452_vm4, %v1037_v41, %v449_v61  ;;  %v599_v8 = vor.u32 1.1754944e-38, %v598_v33  ;;  %vm597_vm15 = vcmp.eq.f32.partialorder %v596_v38, 8.507059e+37  ;;  %v1035_v61 = vld [vmem:[%s1378_s5] ss:$0 sm:$0xff] }
  0xd4   : > { %v458_v7 = vsel %vm455_vm5, %v457_v0, %v453_v50  ;;  %v550_v34 = vmul.f32 %v1039_v53, %v549_v1 }
  0xd5   : > { %v459_v10 = vmul.f32 %v458_v7, %v434_v60 }
  0xd6   : > { %v551_v12 = vadd.f32 %v1039_v53, %v550_v34 }
  0xd7   : > { %v925_v13 = vclamps-f32 %v459_v10, 1.0  ;;  %v1041_v25 = vpop.eup %1040 }
  0xd8   : > { %v555_v17 = vsel %vm554_vm8, %v1039_v53, %v551_v12  ;;  %v588_v29 = vmul.f32 %v1041_v25, %v586_v9  ;;  %vm593_vm12 = vweird.f32 %v1041_v25 }
  0xd9   : > { %v462_v19 = vadd.f32 1.0, %v925_v13  ;;  %v560_v20 = vsel %vm557_vm9, %v559_v14, %v555_v17  ;;  %vm594_vm14 = vmor %vm592_vm13, %vm593_vm12 }
  0xda   : > { %v561_v22 = vmul.f32 %v560_v20, %v536_v16  ;;  %v589_v32 = vsub.f32 1.0, %v588_v29 }
  0xdb   : > { %v463_v23 = vmul.f32 %v462_v19, %v420_v18 }
  0xdc   : > { %v929_v26 = vclamps-f32 %v561_v22, 1.0  ;;  %v590_v36 = vmul.f32 %v1041_v25, %v589_v32 }
  0xdd   : > { %v628_v27 = vpack.c.bf16 %v463_v23, %v463_v23 }
  0xde   : > { %v604_v40 = vadd.f32 1.0, %v929_v26  ;;  %v591_v42 = vadd.f32 %v1041_v25, %v590_v36 }
  0xdf   : > { %943 = vmatmul.msk.bf16.vlgmr.msrb.gmra.mxu2 %vm646_vm10, %v628_v27 }
  0xe0   : > { %v606_v30 = vmul.f32 %v604_v40, %v520_v31  ;;  %v595_v37 = vsel %vm594_vm14, %v1041_v25, %v591_v42  ;;  %v782_v42 = vld [vmem:[%s1379_s6] sm:$0xff] }
  0xe1   : > { %v600_v45 = vsel %vm597_vm15, %v599_v8, %v595_v37 }
  0xe2   : > { %v621_v41 = vsel %vm615_vm11, %v606_v30, 0.0  ;;  %v601_v46 = vmul.f32 %v600_v45, %v576_v44 }
  0xe3   : > { %v623_v43 = vpack.c.bf16 %v621_v41, %v621_v41 }
  0xe4   : > { %v930_v47 = vclamps-f32 %v601_v46, 1.0 }
  0xe5   : > { %952 = vmatmul.msk.bf16.vlgmr.msrb.gmra.mxu3 %vm646_vm10, %v623_v43 }
  0xe6   : > { %v605_v49 = vadd.f32 1.0, %v930_v47 }
  0xe8   : > { %v607_v51 = vmul.f32 %v605_v49, %v521_v48 }
  0xea   : > { %v691_v52 = vpack.c.bf16 %v607_v51, %v621_v41 }
  0xec   : > { %v700_v53 = vshll.u32 %v691_v52, 16  ;;  %v698_v54 = vshrl.u32 %v691_v52, 16 }
  0xee   : > { %v702_v39 = vrot.slane %v700_v53, 1 }
  0xf0   : > { %v703_v55 = vor.u32 %v702_v39, %v698_v54 }
  0xf2   : > { %965 = vmatmul.msk.bf16.vlgmr.msra.gmra.mxu0 %vm646_vm10, %v703_v55 }
 0x162   : > { %v659_v57 = vpop.f32.mrf.mxu2 }
 0x168   : > { %v687_v62 = vpop.f32.mrf.mxu3 }
 0x169   : > { %v688_v60 = vadd.f32 %v687_v62, %v659_v57 }
 0x16a   : > { %v661_v58 = vpop.f32.mrf.mxu2 }
 0x16f   : > { %v728_v63 = vpop.f32.mrf.mxu0 }
 0x170   : > { %v689_v59 = vpop.f32.mrf.mxu3  ;;  %v732_v56 = vadd.f32 %v728_v63, %v688_v60 }
 0x172   : > { %v737_v0 = vadd.f32 %v1035_v61, %v732_v56 }
 0x174   : > { %v739_v1 = vmul.f32 0.70710677, %v737_v0  ;;  %v738_v38 = vmul.f32 0.5, %v737_v0 }
 0x176   : > { %v740_v2 = vmul.f32 %v739_v1, %v739_v1 }
 0x177   : > { %v730_v50 = vpop.f32.mrf.mxu0 }
 0x178   : > { %v741_v3 = vmin.f32 %v740_v2, 16.0 }
 0x17a   : > { %v742_v4 = vmul.f32 2.1237322e-06, %v741_v3  ;;  %v753_v5 = vmul.f32 3.8918573e-05, %v741_v3 }
 0x17c   : > { %v743_v6 = vadd.f32 0.00028619796, %v742_v4  ;;  %v754_v7 = vadd.f32 0.001143296, %v753_v5 }
 0x17e   : > { %v744_v34 = vmul.f32 %v743_v6, %v741_v3  ;;  %v755_v9 = vmul.f32 %v754_v7, %v741_v3 }
 0x180   : > { %v756_v10 = vadd.f32 0.014752088, %v755_v9  ;;  %v745_v11 = vadd.f32 0.0036580483, %v744_v34 }
 0x182   : > { %v757_v12 = vmul.f32 %v756_v10, %v741_v3  ;;  %v746_v14 = vmul.f32 %v745_v11, %v741_v3 }
 0x184   : > { %v758_v13 = vadd.f32 0.112945676, %v757_v12  ;;  %v747_v17 = vadd.f32 0.05243302, %v746_v14 }
 0x186   : > { %v759_v15 = vmul.f32 %v758_v13, %v741_v3  ;;  %v748_v20 = vmul.f32 %v747_v17, %v741_v3 }
 0x188   : > { %v760_v16 = vadd.f32 0.4994258, %v759_v15  ;;  %v749_v21 = vadd.f32 0.18741608, %v748_v20 }
 0x18a   : > { %v761_v18 = vmul.f32 %v760_v16, %v741_v3  ;;  %v750_v23 = vmul.f32 %v749_v21, %v741_v3 }
 0x18c   : > { %v762_v19 = vadd.f32 1.0, %v761_v18  ;;  %v751_v27 = vadd.f32 1.1283791, %v750_v23 }
 0x18e   : > { %1042 = vrcp.f32 %v762_v19  ;;  %v774_v26 = vand.u32 2147483648, %v762_v19  ;;  %v772_v29 = vand.u32 2147483647, %v762_v19  ;;  %vm768_vm1 = vweird.f32 %v762_v19 }
 0x18f   : > { %v752_v32 = vmul.f32 %v751_v27, %v739_v1 }
 0x190   : > { %v775_v40 = vor.u32 1.1754944e-38, %v774_v26  ;;  %vm773_vm3 = vcmp.eq.f32.partialorder %v772_v29, 8.507059e+37 }
 0x194   : > { %v1043_v22 = vpop.eup %1042 }
 0x195   : > { %v764_v24 = vmul.f32 %v1043_v22, %v762_v19  ;;  %vm769_vm0 = vweird.f32 %v1043_v22 }
 0x196   : > { %vm770_vm2 = vmor %vm768_vm1, %vm769_vm0 }
 0x197   : > { %v765_v25 = vsub.f32 1.0, %v764_v24 }
 0x199   : > { %v766_v28 = vmul.f32 %v1043_v22, %v765_v25 }
 0x19b   : > { %v767_v31 = vadd.f32 %v1043_v22, %v766_v28 }
 0x19d   : > { %v771_v30 = vsel %vm770_vm2, %v1043_v22, %v767_v31 }
 0x19e   : > { %v776_v33 = vsel %vm773_vm3, %v775_v40, %v771_v30 }
 0x19f   : > { %v777_v35 = vmul.f32 %v776_v33, %v752_v32 }
 0x1a1   : > { %v966_v36 = vclamps-f32 %v777_v35, 1.0 }
 0x1a3   : > { %v780_v41 = vadd.f32 1.0, %v966_v36 }
 0x1a5   : > { %v781_v43 = vmul.f32 %v780_v41, %v738_v38 }
 0x1a7   : > { %v783_v8 = vadd.f32 %v782_v42, %v781_v43 }
 0x1a9   : > { %784 = vst.msk [vmem:[%s313_s12] sm:$0xff] %vm646_vm10, %v783_v8 }
 0x1aa   : > { %1071 = shalt.err (!%p1068_p5)
}
 0x1ab   : > { %979 = dma.vmem_to_hbm [thread:$0]  (%p1204_p4), %s800_s15, 128, %s802_s16, %s786_s27  }
 0x1ac PF: > { %p985_p6 = scmp.ge.s32.totalorder %s1122_s29, 2  ;;  %s813_s19 = sand.u32 1, %s1102_s24  }
 0x1ad   : > { %s814_s8 = scalar_lea.sflag [#allocation3], %s813_s19 }
 0x1ae   : > { %p982_p7 = pnand %p985_p6, %p1211_p8 }
 0x1b0   : > { %p983_p9 = pneg %p982_p7 }
 0x1b2   : > { %1097 = dma.done.wait (%p983_p9), %s814_s8, 128  }
 0x1b3   : > { %1099 = vsyncadd (%p983_p9), %s814_s8, 4294967168  ;;  %s20_s29 = sadd.s32 1, %s1122_s29   ;;  %s1383_s24 = smov %s1106_s25 }
 0x1b4   : > { %p17_p10 = scmp.ge.s32.totalorder %s20_s29, 4   ;;  %s1384_s25 = smov %s1110_s26 }
 0x1b5   : > { %s1385_s26 = smov %s1217_s14  ;;  %s1386_s27 = smov %s1118_s28 }
 0x1b6   : > { %s1387_s28 = smov %s1389_s9  ;;  %19 = sbr.rel (!%p17_p10) target bundleno = 4 (0x4), region = 96 }
 0x1bb   :  { %820 = vsyncpa [#allocation3], 1 }
 0x1bc   :  { %822 = vsyncpa [#allocation3 + $0x1], 1 }

</bundles_post_ra>
